<compile_context>
chip_gen: v7x
topology: tpu7x:2x2x1
jax: 0.10.0
libtpu: 0.0.40
codegen_flags: <defaults>
</compile_context>

<pallas_src>
import math
from functools import partial

import jax
import jax.numpy as jnp
from jax.experimental import pallas as pl
from jax.experimental.pallas import tpu as pltpu


def _round_up(a: int, b: int) -> int:
    return (a + b - 1) // b * b


def _mlp_kernel(x_ref, w_in_ref, w_hid_ref, w_out_ref, o_ref, *, n_hidden_matmuls):
    # Input layer: (TM, dim_in) @ (dim_in, H) -> f32 accumulate on MXU,
    # then cast-then-ReLU in bf16 (halves the live intermediate).
    h = jnp.dot(x_ref[...], w_in_ref[...], preferred_element_type=jnp.float32)
    h = jnp.maximum(h.astype(jnp.bfloat16), 0)

    # Hidden layers: (TM, H) @ (H, H) -> bf16 ReLU. Static unroll (tiny count).
    for l in range(n_hidden_matmuls):
        h = jnp.dot(h, w_hid_ref[l], preferred_element_type=jnp.float32)
        h = jnp.maximum(h.astype(jnp.bfloat16), 0)

    # Output layer: (TM, H) @ (H, dim_out), no activation; `.float()` => f32.
    o_ref[...] = jnp.dot(h, w_out_ref[...], preferred_element_type=jnp.float32)


def tcnn_network_forward(x, w_in, w_hid, w_out, *, block_m=512, vmem_limit_bytes=None):
    """x: (N, dim_in) f32/bf16; weights bf16. Returns (N, dim_out) float32."""
    n, dim_in = x.shape
    hidden = w_in.shape[1]
    dim_out = w_out.shape[1]
    n_hidden_matmuls = w_hid.shape[0]

    # tcnn's FullyFusedMLP computes in half precision: cast at the boundary so
    # the kernel always runs pure bf16 x bf16 -> f32 MXU matmuls (and f32
    # callers don't pay 2x input HBM traffic).
    x = x.astype(jnp.bfloat16)

    # Batch tile: as large as requested (VMEM is a non-issue: even TM=2048 is
    # ~1 MiB of double-buffered tiles), but capped so the grid keeps >= 2
    # steps -> both v7x TensorCores get work. Must stay a multiple of 8.
    bm = max(8, min(block_m, _round_up(pl.cdiv(n, 2), 8)))
    padded_n = _round_up(n, bm)
    if padded_n != n:
        x = jnp.pad(x, ((0, padded_n - n), (0, 0)))
    grid = (padded_n // bm,)

    flops = 2 * padded_n * (dim_in * hidden
                            + n_hidden_matmuls * hidden * hidden
                            + hidden * dim_out)
    bytes_accessed = (padded_n * dim_in * 2          # x (bf16)
                      + padded_n * dim_out * 4       # out (f32)
                      + (w_in.size + w_hid.size + w_out.size) * 2)
    cost = pl.CostEstimate(flops=flops, transcendentals=0,
                           bytes_accessed=bytes_accessed)

    out = pl.pallas_call(
        partial(_mlp_kernel, n_hidden_matmuls=n_hidden_matmuls),
        out_shape=jax.ShapeDtypeStruct((padded_n, dim_out), jnp.float32),
        grid=grid,
        in_specs=[
            pl.BlockSpec((bm, dim_in), lambda i: (i, 0)),               # x tile
            pl.BlockSpec((dim_in, hidden), lambda i: (0, 0)),           # W_in (resident)
            pl.BlockSpec((n_hidden_matmuls, hidden, hidden),
                         lambda i: (0, 0, 0)),                          # hidden weights
            pl.BlockSpec((hidden, dim_out), lambda i: (0, 0)),          # W_out
        ],
        out_specs=pl.BlockSpec((bm, dim_out), lambda i: (i, 0)),
        compiler_params=pltpu.CompilerParams(
            dimension_semantics=("parallel",),
            # Only needed on v5e (16 MiB default scoped VMEM) when pushing
            # block_m past ~4K; harmless to leave configurable.
            vmem_limit_bytes=vmem_limit_bytes,
        ),
        cost_estimate=cost,
    )(x, w_in, w_hid, w_out)

    return out[:n] if padded_n != n else out


def init_params(key, dim_in, dim_out, hidden, n_hidden_layers):
    """Deterministic xavier-uniform-ish init, bf16 weights (tcnn computes in half)."""
    assert n_hidden_layers >= 2, "this demo assumes >= 2 hidden layers"
    k1, k2, k3 = jax.random.split(key, 3)

    def xavier(k, fan_in, fan_out, shape):
        bound = math.sqrt(6.0 / (fan_in + fan_out))
        return jax.random.uniform(k, shape, jnp.float32, -bound, bound).astype(jnp.bfloat16)

    w_in = xavier(k1, dim_in, hidden, (dim_in, hidden))
    w_hid = xavier(k2, hidden, hidden, (n_hidden_layers - 1, hidden, hidden))
    w_out = xavier(k3, hidden, dim_out, (hidden, dim_out))
    return w_in, w_hid, w_out


def reference_forward(x, w_in, w_hid, w_out):
    """Pure-JAX reference mirroring the kernel's bf16 activation flow."""
    h = jnp.dot(x.astype(jnp.bfloat16).astype(jnp.float32), w_in.astype(jnp.float32))
    h = jnp.maximum(h, 0.0)
    for l in range(w_hid.shape[0]):
        h = jnp.maximum(jnp.dot(h.astype(jnp.bfloat16).astype(jnp.float32),
                                w_hid[l].astype(jnp.float32)), 0.0)
    return jnp.dot(h.astype(jnp.bfloat16).astype(jnp.float32),
                   w_out.astype(jnp.float32))


if __name__ == "__main__":
    # Typical tcnn config: {"otype": "FullyFusedMLP", "activation": "ReLU",
    #                       "output_activation": "None", "n_neurons": 64,
    #                       "n_hidden_layers": 2}
    DIM_IN, DIM_OUT = 16, 4
    HIDDEN, N_HIDDEN_LAYERS = 64, 2

    key = jax.random.PRNGKey(0)
    kx, kp = jax.random.split(key)
    w_in, w_hid, w_out = init_params(kp, DIM_IN, DIM_OUT, HIDDEN, N_HIDDEN_LAYERS)

    # Exercise both a ragged batch (padding/masked-tail path) and a small
    # multiple-of-128 batch; caller hands in f32, wrapper casts to bf16.
    for n in (1000, 256):
        x = jax.random.normal(jax.random.fold_in(kx, n), (n, DIM_IN), dtype=jnp.float32)
        out = jax.block_until_ready(tcnn_network_forward(x, w_in, w_hid, w_out))
        ref = reference_forward(x, w_in, w_hid, w_out)
        assert out.shape == (n, DIM_OUT)
        assert out.dtype == jnp.float32
        assert jnp.allclose(out, ref, atol=5e-2, rtol=5e-2), \
            float(jnp.max(jnp.abs(out - ref)))

    print("KERNEL_OK")
</pallas_src>

<mosaic_0001>
module attributes {stable_mosaic.version = 11 : i64} {
  func.func @_mlp_kernel(%arg0: i32, %arg1: memref<504x16xbf16, #tpu.memory_space<vmem>>, %arg2: memref<16x64xbf16, #tpu.memory_space<vmem>>, %arg3: memref<1x64x64xbf16, #tpu.memory_space<vmem>>, %arg4: memref<64x4xbf16, #tpu.memory_space<vmem>>, %arg5: memref<504x4xf32, #tpu.memory_space<vmem>>) attributes {dimension_semantics = [#tpu.dimension_semantics<parallel>], iteration_bounds = array<i64: 2>, scalar_prefetch = 0 : i64, scratch_operands = 0 : i64, tpu.core_type = #tpu.core_type<tc>, window_params = [{transform_indices = @transform_0, window_bounds = array<i64: 504, 16>}, {pipeline_mode = #tpu.pipeline_mode<synchronous>, transform_indices = @transform_1, window_bounds = array<i64: 16, 64>}, {pipeline_mode = #tpu.pipeline_mode<synchronous>, transform_indices = @transform_2, window_bounds = array<i64: 1, 64, 64>}, {pipeline_mode = #tpu.pipeline_mode<synchronous>, transform_indices = @transform_3, window_bounds = array<i64: 64, 4>}, {transform_indices = @transform_4, window_bounds = array<i64: 504, 4>}]} {
    %c0 = arith.constant 0 : index
    %c0_0 = arith.constant 0 : index
    %0 = vector.load %arg1[%c0, %c0_0] : memref<504x16xbf16, #tpu.memory_space<vmem>>, vector<504x16xbf16>
    %c0_1 = arith.constant 0 : index
    %c0_2 = arith.constant 0 : index
    %1 = vector.load %arg2[%c0_1, %c0_2] : memref<16x64xbf16, #tpu.memory_space<vmem>>, vector<16x64xbf16>
    %cst = arith.constant dense<0.000000e+00> : vector<504x64xf32>
    %2 = tpu.matmul %0, %1, %cst {dimension_numbers = #tpu.dot_dimension_numbers<[1], [0], [0], [1], [0, 0, 1, 1], [], []>} : vector<504x16xbf16>, vector<16x64xbf16>, vector<504x64xf32> -> vector<504x64xf32>
    %3 = arith.truncf %2 : vector<504x64xf32> to vector<504x64xbf16>
    %cst_3 = arith.constant 0.000000e+00 : bf16
    %4 = vector.broadcast %cst_3 : bf16 to vector<504x64xbf16>
    %5 = arith.maximumf %3, %4 : vector<504x64xbf16>
    %c0_4 = arith.constant 0 : index
    %c0_5 = arith.constant 0 : index
    %c0_6 = arith.constant 0 : index
    %6 = vector.load %arg3[%c0_4, %c0_5, %c0_6] : memref<1x64x64xbf16, #tpu.memory_space<vmem>>, vector<1x64x64xbf16>
    %7 = vector.shape_cast %6 : vector<1x64x64xbf16> to vector<64x64xbf16>
    %cst_7 = arith.constant dense<0.000000e+00> : vector<504x64xf32>
    %8 = tpu.matmul %5, %7, %cst_7 {dimension_numbers = #tpu.dot_dimension_numbers<[1], [0], [0], [1], [0, 0, 1, 1], [], []>} : vector<504x64xbf16>, vector<64x64xbf16>, vector<504x64xf32> -> vector<504x64xf32>
    %9 = arith.truncf %8 : vector<504x64xf32> to vector<504x64xbf16>
    %cst_8 = arith.constant 0.000000e+00 : bf16
    %10 = vector.broadcast %cst_8 : bf16 to vector<504x64xbf16>
    %11 = arith.maximumf %9, %10 : vector<504x64xbf16>
    %c0_9 = arith.constant 0 : index
    %c0_10 = arith.constant 0 : index
    %12 = vector.load %arg4[%c0_9, %c0_10] : memref<64x4xbf16, #tpu.memory_space<vmem>>, vector<64x4xbf16>
    %cst_11 = arith.constant dense<0.000000e+00> : vector<504x4xf32>
    %13 = tpu.matmul %11, %12, %cst_11 {dimension_numbers = #tpu.dot_dimension_numbers<[1], [0], [0], [1], [0, 0, 1, 1], [], []>} : vector<504x64xbf16>, vector<64x4xbf16>, vector<504x4xf32> -> vector<504x4xf32>
    %c0_12 = arith.constant 0 : index
    %c0_13 = arith.constant 0 : index
    %14 = vector.load %arg5[%c0_12, %c0_13] : memref<504x4xf32, #tpu.memory_space<vmem>>, vector<504x4xf32>
    tpu.vector_store %arg5[%c0_12, %c0_13], %13 {strides = array<i32>} : memref<504x4xf32, #tpu.memory_space<vmem>>, vector<504x4xf32>,
    return
  }
  func.func @transform_0(%arg0: i32) -> (i32, i32) {
    %c0_i32 = arith.constant 0 : i32
    %c0_i32_0 = arith.constant 0 : i32
    return %arg0, %c0_i32 : i32, i32
  }
  func.func @transform_1(%arg0: i32) -> (i32, i32) {
    %c0_i32 = arith.constant 0 : i32
    %c0_i32_0 = arith.constant 0 : i32
    %c0_i32_1 = arith.constant 0 : i32
    return %c0_i32, %c0_i32_0 : i32, i32
  }
  func.func @transform_2(%arg0: i32) -> (i32, i32, i32) {
    %c0_i32 = arith.constant 0 : i32
    %c0_i32_0 = arith.constant 0 : i32
    %c0_i32_1 = arith.constant 0 : i32
    %c0_i32_2 = arith.constant 0 : i32
    return %c0_i32, %c0_i32_0, %c0_i32_1 : i32, i32, i32
  }
  func.func @transform_3(%arg0: i32) -> (i32, i32) {
    %c0_i32 = arith.constant 0 : i32
    %c0_i32_0 = arith.constant 0 : i32
    %c0_i32_1 = arith.constant 0 : i32
    return %c0_i32, %c0_i32_0 : i32, i32
  }
  func.func @transform_4(%arg0: i32) -> (i32, i32) {
    %c0_i32 = arith.constant 0 : i32
    %c0_i32_0 = arith.constant 0 : i32
    return %arg0, %c0_i32 : i32, i32
  }
}

</mosaic_0001>

<bundles_post_ra>
// kernel: tpu_custom_call.1
= control target key start
LH: loop header
LB: loop body
LE: loop exit
PB: predicated region body
PF: predicated region fallthrough
CT: control target
= control target key end

     0   :  { %s2444_s15 = smov 0   ;;  %s2883_s0 = inlined_call_operand.vmem [shape: bf16[1008,16], index: 0, kind: input, shape index: {}]   ;;  %s2884_s1 = inlined_call_operand.vmem [shape: bf16[16,64], index: 1, kind: input, shape index: {}]   ;;  %s2885_s2 = inlined_call_operand.vmem [shape: bf16[1,64,64], index: 2, kind: input, shape index: {}]   ;;  %s2886_s3 = inlined_call_operand.vmem [shape: bf16[64,4], index: 3, kind: input, shape index: {}]   ;;  %s2887_s4 = inlined_call_operand.vmem [shape: f32[1008,4], index: 4, kind: output, shape index: {}]  }
   0x1 LB: > { %s1897_s16 = sadd.s32 4294967295, %s2416_s15   ;;  %p1901_p0 = scmp.ge.s32.totalorder %s2416_s15, 1  ;;  %s2416_s15 = sphi %s2444_s15, %s14_s15  }
   0x2   : > { %p163_p1 = scmp.lt.s32.totalorder %s2416_s15, 3 }
   0x4   : > { %p164_p2 = pnand %p1901_p0, %p163_p1 }
   0x5   : > { %v2369_v0 = vld [vmem:[%s2884_s1] sm:$0xff] (!%p164_p2)   ;;  %s189_s19 = smul.u32 (!%p164_p2), 63, %s1897_s16  ;;  %vm431_vm0 = vcmask (!%p164_p2), 130048   ;;  %v2403_v10 = vld [vmem:[%s2885_s2 + $0x8] sm:$0xff] (!%p164_p2)   ;;  %v2404_v13 = vld [vmem:[%s2885_s2 + $0x10] sm:$0xff] (!%p164_p2)   ;;  %vm912_vm1 = vcmask (!%p164_p2), 523264  }
   0x6   : > { %167 = sbr.rel (%p164_p2) target bundleno = 794 (0x31a), region = 36  ;;  %v2402_v1 = vld [vmem:[%s2885_s2] sm:$0xff] (!%p164_p2)   ;;  %2148 = vmatprep.subr.bf16.mxu0 (!%p164_p2), %v2369_v0  ;;  %2358 = vmatprep.subr.bf16.mxu1 (!%p164_p2), %v2369_v0  ;;  %v2405_v18 = vld [vmem:[%s2885_s2 + $0x18] sm:$0xff] (!%p164_p2)   ;;  %v2407_v40 = vld [vmem:[%s2886_s3 + $0x8] sm:$0xff] (!%p164_p2)   ;;  %v2418_v46 = vmov (!%p164_p2), 0   ;;  %vm1777_vm2 = vcmask (!%p164_p2), 31744  }
   0x7   : > { %p190_p3 = scmp.lt.s32.totalorder (!%p164_p2), %s189_s19, 125  ;;  %2149 = vmatpush3.bf16.msra.mxu0 (!%p164_p2), %v2369_v0  ;;  %2359 = vmatpush3.bf16.msra.mxu1 (!%p164_p2), %v2369_v0  ;;  %v2406_v39 = vld [vmem:[%s2886_s3] sm:$0xff] (!%p164_p2)   ;;  %v2408_v45 = vld [vmem:[%s2886_s3 + $0x10] sm:$0xff] (!%p164_p2)   ;;  %v2409_v51 = vld [vmem:[%s2886_s3 + $0x18] sm:$0xff] (!%p164_p2)  }
   0x8   : > { %2214 = vmatprep.subr.bf16.mxu1 (!%p164_p2), %v2402_v1  ;;  %2286 = vmatprep.subr.bf16.mxu0 (!%p164_p2), %v2406_v39 }
   0xd   : > { %s2889_s19 = smov (!%p190_p3, %s189_s19), 125 }
   0xe   : > { %s1902_s22 = sshll.u32 %s2889_s19, 2  ;;  %s1903_s14 = sshll.u32 %s2889_s19, 3 }
   0xf   : > { %s2464_s25 = scalar_lea.vmem %s2883_s0, %s1902_s22  ;;  %s2752_s18 = scalar_lea.vmem %s2887_s4, %s1903_s14 }
  0x10   : > { %v2370_v2 = vld [vmem:[%s2464_s25] sm:$0xff]   ;;  %v2371_v3 = vld [vmem:[%s2464_s25 + $0x8] sm:$0xff]   ;;  %v2372_v4 = vld [vmem:[%s2464_s25 + $0x10] sm:$0xff]  }
  0x11   : > { %2150 = vmatprep.mubr.msk.bf16.mxu0 %vm431_vm0, %v2370_v2  ;;  %v2373_v5 = vld [vmem:[%s2464_s25 + $0x18] sm:$0xff]   ;;  %v2374_v6 = vld [vmem:[%s2464_s25 + $0x20] sm:$0xff]   ;;  %v2375_v7 = vld [vmem:[%s2464_s25 + $0x28] sm:$0xff]  }
  0x12   : > { %2151 = vmatmul.mubr.msk.bf16.vlgmr.msra.gmra.mrb[0].mxu0 %vm431_vm0, %v2371_v3  ;;  %v2376_v8 = vld [vmem:[%s2464_s25 + $0x30] sm:$0xff]   ;;  %v2386_v9 = vld [vmem:[%s2464_s25 + $0x80] sm:$0xff]   ;;  %v2387_v11 = vld [vmem:[%s2464_s25 + $0x88] sm:$0xff]  }
  0x13   : > { %2154 = vmatprep.mubr.msk.bf16.mxu0 %vm431_vm0, %v2372_v4  ;;  %2182 = vmatprep.mubr.msk.bf16.mxu1 %vm431_vm0, %v2386_v9  ;;  %v2388_v12 = vld [vmem:[%s2464_s25 + $0x90] sm:$0xff]   ;;  %v2377_v14 = vld [vmem:[%s2464_s25 + $0x38] sm:$0xff]   ;;  %v2378_v15 = vld [vmem:[%s2464_s25 + $0x40] sm:$0xff]  }
  0x14   : > { %2183 = vmatmul.mubr.msk.bf16.vlgmr.msra.gmra.mrb[0].mxu1 %vm431_vm0, %v2387_v11  ;;  %v2389_v16 = vld [vmem:[%s2464_s25 + $0x98] sm:$0xff]   ;;  %v2390_v17 = vld [vmem:[%s2464_s25 + $0xa0] sm:$0xff]   ;;  %v2379_v19 = vld [vmem:[%s2464_s25 + $0x48] sm:$0xff]   ;;  %2287 = vmatpush3.bf16.msra.mxu0 %v2406_v39 }
  0x15   : > { %2186 = vmatprep.mubr.msk.bf16.mxu1 %vm431_vm0, %v2388_v12  ;;  %2215 = vmatpush3.bf16.msra.mxu1 %v2402_v1  ;;  %v2391_v20 = vld [vmem:[%s2464_s25 + $0xa8] sm:$0xff]   ;;  %v2380_v21 = vld [vmem:[%s2464_s25 + $0x50] sm:$0xff]   ;;  %v2381_v23 = vld [vmem:[%s2464_s25 + $0x58] sm:$0xff]  }
  0x16   : > { %2216 = vmatprep.subr.bf16.mxu1 %v2403_v10  ;;  %v2392_v22 = vld [vmem:[%s2464_s25 + $0xb0] sm:$0xff]   ;;  %v2393_v24 = vld [vmem:[%s2464_s25 + $0xb8] sm:$0xff]   ;;  %v2382_v25 = vld [vmem:[%s2464_s25 + $0x60] sm:$0xff]   ;;  %2288 = vmatprep.subr.bf16.mxu0 %v2407_v40 }
  0x17   : > { %v2394_v26 = vld [vmem:[%s2464_s25 + $0xc0] sm:$0xff]   ;;  %v2383_v27 = vld [vmem:[%s2464_s25 + $0x68] sm:$0xff]   ;;  %v2384_v29 = vld [vmem:[%s2464_s25 + $0x70] sm:$0xff]  }
  0x18   : > { %v2395_v28 = vld [vmem:[%s2464_s25 + $0xc8] sm:$0xff]   ;;  %v2396_v30 = vld [vmem:[%s2464_s25 + $0xd0] sm:$0xff]   ;;  %v2385_v31 = vld [vmem:[%s2464_s25 + $0x78] sm:$0xff]   ;;  %2289 = vmatpush3.bf16.msra.mxu0 %v2407_v40 }
  0x19   : > { %2217 = vmatpush3.bf16.msra.mxu1 %v2403_v10  ;;  %v2397_v32 = vld [vmem:[%s2464_s25 + $0xd8] sm:$0xff]   ;;  %v2398_v33 = vld [vmem:[%s2464_s25 + $0xe0] sm:$0xff]   ;;  %v2399_v34 = vld [vmem:[%s2464_s25 + $0xe8] sm:$0xff]   ;;  %2290 = vmatprep.subr.bf16.mxu0 %v2408_v45 }
  0x1a   : > { %2155 = vmatmul.mubr.msk.bf16.gmra.mrb[4].mxu0 %vm431_vm0, %v2373_v5  ;;  %2218 = vmatprep.subr.bf16.mxu1 %v2404_v13  ;;  %v2400_v35 = vld [vmem:[%s2464_s25 + $0xf0] sm:$0xff]   ;;  %v2401_v36 = vld [vmem:[%s2464_s25 + $0xf8] ss:$0 sps:$4 sm:$0xff]  }
  0x1b   : > { %2158 = vmatprep.mubr.msk.bf16.mxu0 %vm431_vm0, %v2374_v6 }
  0x1c   : > { %2187 = vmatmul.mubr.msk.bf16.gmra.mrb[4].mxu1 %vm431_vm0, %v2389_v16  ;;  %2291 = vmatpush3.bf16.msra.mxu0 %v2408_v45 }
  0x1d   : > { %2190 = vmatprep.mubr.msk.bf16.mxu1 %vm431_vm0, %v2390_v17  ;;  %2219 = vmatpush3.bf16.msra.mxu1 %v2404_v13 }
  0x1e   : > { %2220 = vmatprep.subr.bf16.mxu1 %v2405_v18  ;;  %2292 = vmatprep.subr.bf16.mxu0 %v2409_v51 }
  0x20   : > { %2293 = vmatpush3.bf16.msra.mxu0 %v2409_v51 }
  0x21   : > { %2221 = vmatpush3.bf16.msra.mxu1 %v2405_v18 }
  0x22   : > { %2159 = vmatmul.mubr.msk.bf16.gmra.mrb[8].mxu0 %vm431_vm0, %v2375_v7 }
  0x23   : > { %2162 = vmatprep.mubr.msk.bf16.mxu0 %vm431_vm0, %v2376_v8 }
  0x24   : > { %2191 = vmatmul.mubr.msk.bf16.gmra.mrb[8].mxu1 %vm431_vm0, %v2391_v20 }
  0x25   : > { %2194 = vmatprep.mubr.msk.bf16.mxu1 %vm431_vm0, %v2392_v22 }
  0x2a   : > { %2163 = vmatmul.mubr.msk.bf16.gmra.mrb[12].mxu0 %vm431_vm0, %v2377_v14 }
  0x2b   : > { %2166 = vmatprep.mubr.msk.bf16.mxu0 %vm431_vm0, %v2378_v15 }
  0x2c   : > { %2195 = vmatmul.mubr.msk.bf16.gmra.mrb[12].mxu1 %vm431_vm0, %v2393_v24 }
  0x2d   : > { %2198 = vmatprep.mubr.msk.bf16.mxu1 %vm431_vm0, %v2394_v26 }
  0x32   : > { %2167 = vmatmul.mubr.msk.bf16.gmra.mrb[16].mxu0 %vm431_vm0, %v2379_v19 }
  0x33   : > { %2170 = vmatprep.mubr.msk.bf16.mxu0 %vm431_vm0, %v2380_v21 }
  0x34   : > { %2199 = vmatmul.mubr.msk.bf16.gmra.mrb[16].mxu1 %vm431_vm0, %v2395_v28 }
  0x35   : > { %2202 = vmatprep.mubr.msk.bf16.mxu1 %vm431_vm0, %v2396_v30 }
  0x3a   : > { %2171 = vmatmul.mubr.msk.bf16.gmra.mrb[20].mxu0 %vm431_vm0, %v2381_v23 }
  0x3b   : > { %2174 = vmatprep.mubr.msk.bf16.mxu0 %vm431_vm0, %v2382_v25 }
  0x3c   : > { %2203 = vmatmul.mubr.msk.bf16.gmra.mrb[20].mxu1 %vm431_vm0, %v2397_v32 }
  0x3d   : > { %2206 = vmatprep.mubr.msk.bf16.mxu1 %vm431_vm0, %v2398_v33 }
  0x42   : > { %2175 = vmatmul.mubr.msk.bf16.gmra.mrb[24].mxu0 %vm431_vm0, %v2383_v27 }
  0x43   : > { %2178 = vmatprep.mubr.msk.bf16.mxu0 %vm431_vm0, %v2384_v29 }
  0x44   : > { %2207 = vmatmul.mubr.msk.bf16.gmra.mrb[24].mxu1 %vm431_vm0, %v2399_v34 }
  0x45   : > { %2210 = vmatprep.mubr.msk.bf16.mxu1 %vm431_vm0, %v2400_v35 }
  0x4a   : > { %2179 = vmatmul.mubr.msk.bf16.gmra.mrb[28].mxu0 %vm431_vm0, %v2385_v31 }
  0x4c   : > { %2211 = vmatmul.mubr.msk.bf16.gmra.mrb[28].mxu1 %vm431_vm0, %v2401_v36 }
  0xe5   : > { %v2152_v37 = vpop.f32.mrb[0].mxu0 }
  0xe6   : > { %v562_v38 = vpop.f32.mrb[1].mxu0 }
  0xe7   : > { %v2153_v41 = vpop.f32.mrb[2].mxu0  ;;  %v2558_v59 = vpop.f32.mrb[0].mxu1 }
  0xe8   : > { %v817_v42 = vpack.c.bf16 %v2153_v41, %v2152_v37  ;;  %v565_v43 = vpop.f32.mrb[3].mxu0  ;;  %v2561_v61 = vpop.f32.mrb[1].mxu1 }
  0xe9   : > { %v816_v44 = vpack.c.bf16 %v565_v43, %v562_v38  ;;  %v2563_v63 = vpop.f32.mrb[2].mxu1 }
  0xea   : > { %v849_v48 = vmax.bf16 %v2418_v46, %v817_v42  ;;  %v833_v2 = vpack.c.bf16 %v2563_v63, %v2558_v59  ;;  %v2567_v3 = vpop.f32.mrb[3].mxu1 }
  0xeb   : > { %v848_v47 = vmax.bf16 %v2418_v46, %v816_v44  ;;  %v832_v5 = vpack.c.bf16 %v2567_v3, %v2561_v61 }
  0xec   : > { %v865_v3 = vmax.bf16 %v2418_v46, %v833_v2 }
  0xed   : > { %v2156_v49 = vpop.f32.mrb[4].mxu0  ;;  %2222 = vmatprep.mubr.msk.bf16.mxu1 %vm912_vm1, %v848_v47 }
  0xee   : > { %v578_v50 = vpop.f32.mrb[5].mxu0  ;;  %2223 = vmatmul.mubr.msk.bf16.vlgmr.msra.gmra.mrb[32].mxu1 %vm912_vm1, %v849_v48 }
  0xef   : > { %v2157_v52 = vpop.f32.mrb[6].mxu0  ;;  %v2574_v9 = vpop.f32.mrb[4].mxu1 }
  0xf0   : > { %v819_v53 = vpack.c.bf16 %v2157_v52, %v2156_v49  ;;  %v581_v54 = vpop.f32.mrb[7].mxu0  ;;  %v2577_v11 = vpop.f32.mrb[5].mxu1 }
  0xf1   : > { %v818_v55 = vpack.c.bf16 %v581_v54, %v578_v50  ;;  %v2579_v13 = vpop.f32.mrb[6].mxu1 }
  0xf2   : > { %v851_v57 = vmax.bf16 %v2418_v46, %v819_v53  ;;  %v835_v16 = vpack.c.bf16 %v2579_v13, %v2574_v9  ;;  %v2583_v17 = vpop.f32.mrb[7].mxu1 }
  0xf3   : > { %v850_v56 = vmax.bf16 %v2418_v46, %v818_v55  ;;  %v834_v19 = vpack.c.bf16 %v2583_v17, %v2577_v11 }
  0xf4   : > { %v867_v59 = vmax.bf16 %v2418_v46, %v835_v16 }
  0xf5   : > { %v2160_v58 = vpop.f32.mrb[8].mxu0  ;;  %2226 = vmatprep.mubr.msk.bf16.mxu1 %vm912_vm1, %v850_v56  ;;  %v866_v61 = vmax.bf16 %v2418_v46, %v834_v19 }
  0xf6   : > { %v594_v60 = vpop.f32.mrb[9].mxu0  ;;  %2227 = vmatmul.mubr.msk.bf16.gmra.mrb[36].mxu1 %vm912_vm1, %v851_v57 }
  0xf7   : > { %v2161_v62 = vpop.f32.mrb[10].mxu0  ;;  %v2590_v23 = vpop.f32.mrb[8].mxu1 }
  0xf8   : > { %v821_v0 = vpack.c.bf16 %v2161_v62, %v2160_v58  ;;  %v597_v1 = vpop.f32.mrb[11].mxu0  ;;  %v2593_v25 = vpop.f32.mrb[9].mxu1 }
  0xf9   : > { %v820_v4 = vpack.c.bf16 %v597_v1, %v594_v60  ;;  %v2595_v27 = vpop.f32.mrb[10].mxu1 }
  0xfa   : > { %v853_v7 = vmax.bf16 %v2418_v46, %v821_v0  ;;  %v837_v30 = vpack.c.bf16 %v2595_v27, %v2590_v23  ;;  %v2599_v31 = vpop.f32.mrb[11].mxu1 }
  0xfb   : > { %v852_v6 = vmax.bf16 %v2418_v46, %v820_v4  ;;  %v836_v33 = vpack.c.bf16 %v2599_v31, %v2593_v25 }
  0xfc   : > { %v869_v2 = vmax.bf16 %v2418_v46, %v837_v30 }
  0xfd   : > { %v2164_v8 = vpop.f32.mrb[12].mxu0  ;;  %2230 = vmatprep.mubr.msk.bf16.mxu1 %vm912_vm1, %v852_v6  ;;  %v868_v11 = vmax.bf16 %v2418_v46, %v836_v33 }
  0xfe   : > { %v610_v10 = vpop.f32.mrb[13].mxu0  ;;  %2231 = vmatmul.mubr.msk.bf16.gmra.mrb[40].mxu1 %vm912_vm1, %v853_v7 }
  0xff   : > { %v2165_v12 = vpop.f32.mrb[14].mxu0  ;;  %v2606_v37 = vpop.f32.mrb[12].mxu1 }
 0x100   : > { %v823_v14 = vpack.c.bf16 %v2165_v12, %v2164_v8  ;;  %v613_v15 = vpop.f32.mrb[15].mxu0  ;;  %v2609_v39 = vpop.f32.mrb[13].mxu1 }
 0x101   : > { %v822_v18 = vpack.c.bf16 %v613_v15, %v610_v10  ;;  %v2611_v41 = vpop.f32.mrb[14].mxu1 }
 0x102   : > { %v855_v21 = vmax.bf16 %v2418_v46, %v823_v14  ;;  %v839_v44 = vpack.c.bf16 %v2611_v41, %v2606_v37  ;;  %v741_v45 = vpop.f32.mrb[15].mxu1 }
 0x103   : > { %v854_v20 = vmax.bf16 %v2418_v46, %v822_v18  ;;  %v838_v48 = vpack.c.bf16 %v741_v45, %v2609_v39 }
 0x104   : > { %v871_v9 = vmax.bf16 %v2418_v46, %v839_v44 }
 0x105   : > { %v2168_v22 = vpop.f32.mrb[16].mxu0  ;;  %2234 = vmatprep.mubr.msk.bf16.mxu1 %vm912_vm1, %v854_v20  ;;  %v870_v63 = vmax.bf16 %v2418_v46, %v838_v48 }
 0x106   : > { %v626_v24 = vpop.f32.mrb[17].mxu0  ;;  %2235 = vmatmul.mubr.msk.bf16.gmra.mrb[44].mxu1 %vm912_vm1, %v855_v21 }
 0x107   : > { %v2169_v26 = vpop.f32.mrb[18].mxu0  ;;  %v2619_v52 = vpop.f32.mrb[16].mxu1 }
 0x108   : > { %v825_v28 = vpack.c.bf16 %v2169_v26, %v2168_v22  ;;  %v629_v29 = vpop.f32.mrb[19].mxu0  ;;  %v754_v54 = vpop.f32.mrb[17].mxu1 }
 0x109   : > { %v824_v32 = vpack.c.bf16 %v629_v29, %v626_v24  ;;  %v2201_v56 = vpop.f32.mrb[18].mxu1  ;;  %v864_v29 = vmax.bf16 %v2418_v46, %v832_v5 }
 0x10a   : > { %v857_v35 = vmax.bf16 %v2418_v46, %v825_v28  ;;  %v841_v60 = vpack.c.bf16 %v2201_v56, %v2619_v52  ;;  %v757_v62 = vpop.f32.mrb[19].mxu1 }
 0x10b   : > { %v856_v34 = vmax.bf16 %v2418_v46, %v824_v32  ;;  %v840_v1 = vpack.c.bf16 %v757_v62, %v754_v54 }
 0x10c   : > { %v873_v16 = vmax.bf16 %v2418_v46, %v841_v60 }
 0x10d   : > { %v2172_v36 = vpop.f32.mrb[20].mxu0  ;;  %2238 = vmatprep.mubr.msk.bf16.mxu1 %vm912_vm1, %v856_v34  ;;  %v872_v17 = vmax.bf16 %v2418_v46, %v840_v1 }
 0x10e   : > { %v642_v38 = vpop.f32.mrb[21].mxu0  ;;  %2239 = vmatmul.mubr.msk.bf16.gmra.mrb[48].mxu1 %vm912_vm1, %v857_v35 }
 0x10f   : > { %v2173_v40 = vpop.f32.mrb[22].mxu0  ;;  %v2204_v8 = vpop.f32.mrb[20].mxu1 }
 0x110   : > { %v827_v42 = vpack.c.bf16 %v2173_v40, %v2172_v36  ;;  %v645_v43 = vpop.f32.mrb[23].mxu0  ;;  %v770_v12 = vpop.f32.mrb[21].mxu1 }
 0x111   : > { %v826_v47 = vpack.c.bf16 %v645_v43, %v642_v38  ;;  %v2205_v15 = vpop.f32.mrb[22].mxu1 }
 0x112   : > { %v859_v50 = vmax.bf16 %v2418_v46, %v827_v42  ;;  %v843_v21 = vpack.c.bf16 %v2205_v15, %v2204_v8  ;;  %v773_v22 = vpop.f32.mrb[23].mxu1 }
 0x113   : > { %v858_v49 = vmax.bf16 %v2418_v46, %v826_v47  ;;  %v842_v26 = vpack.c.bf16 %v773_v22, %v770_v12 }
 0x114   : > { %v875_v23 = vmax.bf16 %v2418_v46, %v843_v21 }
 0x115   : > { %v2176_v51 = vpop.f32.mrb[24].mxu0  ;;  %2242 = vmatprep.mubr.msk.bf16.mxu1 %vm912_vm1, %v858_v49  ;;  %v874_v13 = vmax.bf16 %v2418_v46, %v842_v26 }
 0x116   : > { %v658_v53 = vpop.f32.mrb[25].mxu0  ;;  %2243 = vmatmul.mubr.msk.bf16.gmra.mrb[52].mxu1 %vm912_vm1, %v859_v50 }
 0x117   : > { %v2177_v55 = vpop.f32.mrb[26].mxu0  ;;  %v2208_v34 = vpop.f32.mrb[24].mxu1 }
 0x118   : > { %v829_v57 = vpack.c.bf16 %v2177_v55, %v2176_v51  ;;  %v661_v58 = vpop.f32.mrb[27].mxu0  ;;  %v786_v35 = vpop.f32.mrb[25].mxu1 }
 0x119   : > { %v828_v0 = vpack.c.bf16 %v661_v58, %v658_v53  ;;  %v2209_v36 = vpop.f32.mrb[26].mxu1 }
 0x11a   : > { %v861_v6 = vmax.bf16 %v2418_v46, %v829_v57  ;;  %v845_v38 = vpack.c.bf16 %v2209_v36, %v2208_v34  ;;  %v789_v39 = vpop.f32.mrb[27].mxu1 }
 0x11b   : > { %v860_v4 = vmax.bf16 %v2418_v46, %v828_v0  ;;  %v844_v40 = vpack.c.bf16 %v789_v39, %v786_v35 }
 0x11c   : > { %v877_v27 = vmax.bf16 %v2418_v46, %v845_v38 }
 0x11d   : > { %v2180_v7 = vpop.f32.mrb[28].mxu0  ;;  %2246 = vmatprep.mubr.msk.bf16.mxu1 %vm912_vm1, %v860_v4  ;;  %v876_v19 = vmax.bf16 %v2418_v46, %v844_v40 }
 0x11e   : > { %v674_v10 = vpop.f32.mrb[29].mxu0  ;;  %2247 = vmatmul.mubr.msk.bf16.gmra.mrb[56].mxu1 %vm912_vm1, %v861_v6 }
 0x11f   : > { %v2181_v14 = vpop.f32.mrb[30].mxu0  ;;  %v2212_v5 = vpop.f32.mrb[28].mxu1 }
 0x120   : > { %v831_v18 = vpack.c.bf16 %v2181_v14, %v2180_v7  ;;  %v677_v20 = vpop.f32.mrb[31].mxu0  ;;  %v802_v42 = vpop.f32.mrb[29].mxu1  ;;  %v847_v30 = vpack.c.bf16 %v2212_v5, %v2212_v5 }
 0x121   : > { %v830_v24 = vpack.c.bf16 %v677_v20, %v674_v10  ;;  %v2213_v43 = vpop.f32.mrb[30].mxu1 }
 0x122   : > { %v863_v32 = vmax.bf16 %v2418_v46, %v831_v18  ;;  %v805_v45 = vpop.f32.mrb[31].mxu1  ;;  %v879_v31 = vmax.bf16 %v2418_v46, %v847_v30 }
 0x123   : > { %v862_v28 = vmax.bf16 %v2418_v46, %v830_v24  ;;  %v846_v47 = vpack.c.bf16 %v805_v45, %v802_v42 }
 0x125   : > { %2250 = vmatprep.mubr.msk.bf16.mxu1 %vm912_vm1, %v862_v28  ;;  %v878_v25 = vmax.bf16 %v2418_v46, %v846_v47 }
 0x126   : > { %2251 = vmatmul.mubr.msk.bf16.gmra.mrb[60].mxu1 %vm912_vm1, %v863_v32 }
 0x127   : > { %2254 = vmatprep.mubr.msk.bf16.mxu1 %vm912_vm1, %v864_v29 }
 0x12e   : > { %2255 = vmatmul.mubr.msk.bf16.gmra.mrb[64].mxu1 %vm912_vm1, %v865_v3 }
 0x12f   : > { %2258 = vmatprep.mubr.msk.bf16.mxu1 %vm912_vm1, %v866_v61 }
 0x136   : > { %2259 = vmatmul.mubr.msk.bf16.gmra.mrb[68].mxu1 %vm912_vm1, %v867_v59 }
 0x137   : > { %2262 = vmatprep.mubr.msk.bf16.mxu1 %vm912_vm1, %v868_v11 }
 0x13e   : > { %2263 = vmatmul.mubr.msk.bf16.gmra.mrb[72].mxu1 %vm912_vm1, %v869_v2 }
 0x13f   : > { %2266 = vmatprep.mubr.msk.bf16.mxu1 %vm912_vm1, %v870_v63 }
 0x146   : > { %2267 = vmatmul.mubr.msk.bf16.gmra.mrb[76].mxu1 %vm912_vm1, %v871_v9 }
 0x147   : > { %2270 = vmatprep.mubr.msk.bf16.mxu1 %vm912_vm1, %v872_v17 }
 0x14e   : > { %2271 = vmatmul.mubr.msk.bf16.gmra.mrb[80].mxu1 %vm912_vm1, %v873_v16 }
 0x14f   : > { %2274 = vmatprep.mubr.msk.bf16.mxu1 %vm912_vm1, %v874_v13 }
 0x156   : > { %2275 = vmatmul.mubr.msk.bf16.gmra.mrb[84].mxu1 %vm912_vm1, %v875_v23 }
 0x157   : > { %2278 = vmatprep.mubr.msk.bf16.mxu1 %vm912_vm1, %v876_v19 }
 0x15e   : > { %2279 = vmatmul.mubr.msk.bf16.gmra.mrb[88].mxu1 %vm912_vm1, %v877_v27 }
 0x15f   : > { %2282 = vmatprep.mubr.msk.bf16.mxu1 %vm912_vm1, %v878_v25 }
 0x166   : > { %2283 = vmatmul.mubr.msk.bf16.gmra.mrb[92].mxu1 %vm912_vm1, %v879_v31 }
 0x1c1   : > { %v2224_v33 = vpop.f32.mrb[32].mxu1 }
 0x1c2   : > { %v1043_v37 = vpop.f32.mrb[33].mxu1 }
 0x1c3   : > { %v2225_v41 = vpop.f32.mrb[34].mxu1 }
 0x1c4   : > { %v1298_v44 = vpack.c.bf16 %v2225_v41, %v2224_v33  ;;  %v1046_v48 = vpop.f32.mrb[35].mxu1 }
 0x1c5   : > { %v1297_v49 = vpack.c.bf16 %v1046_v48, %v1043_v37 }
 0x1c6   : > { %v1330_v51 = vmax.bf16 %v2418_v46, %v1298_v44 }
 0x1c7   : > { %v1329_v50 = vmax.bf16 %v2418_v46, %v1297_v49 }
 0x1c9   : > { %v2228_v52 = vpop.f32.mrb[36].mxu1  ;;  %2294 = vmatprep.mubr.msk.bf16.mxu0 %vm912_vm1, %v1329_v50 }
 0x1ca   : > { %v1059_v53 = vpop.f32.mrb[37].mxu1  ;;  %2295 = vmatmul.mubr.msk.bf16.vlgmr.msra.gmra.mrb[32].mxu0 %vm912_vm1, %v1330_v51 }
 0x1cb   : > { %v2229_v54 = vpop.f32.mrb[38].mxu1 }
 0x1cc   : > { %v1300_v55 = vpack.c.bf16 %v2229_v54, %v2228_v52  ;;  %v1062_v56 = vpop.f32.mrb[39].mxu1 }
 0x1cd   : > { %v1299_v57 = vpack.c.bf16 %v1062_v56, %v1059_v53 }
 0x1ce   : > { %v1332_v60 = vmax.bf16 %v2418_v46, %v1300_v55 }
 0x1cf   : > { %v1331_v58 = vmax.bf16 %v2418_v46, %v1299_v57 }
 0x1d1   : > { %v2232_v62 = vpop.f32.mrb[40].mxu1  ;;  %2298 = vmatprep.mubr.msk.bf16.mxu0 %vm912_vm1, %v1331_v58 }
 0x1d2   : > { %v1075_v0 = vpop.f32.mrb[41].mxu1  ;;  %2299 = vmatmul.mubr.msk.bf16.gmra.mrb[36].mxu0 %vm912_vm1, %v1332_v60 }
 0x1d3   : > { %v2233_v1 = vpop.f32.mrb[42].mxu1 }
 0x1d4   : > { %v1302_v4 = vpack.c.bf16 %v2233_v1, %v2232_v62  ;;  %v1078_v6 = vpop.f32.mrb[43].mxu1 }
 0x1d5   : > { %v1301_v7 = vpack.c.bf16 %v1078_v6, %v1075_v0 }
 0x1d6   : > { %v1334_v10 = vmax.bf16 %v2418_v46, %v1302_v4 }
 0x1d7   : > { %v1333_v8 = vmax.bf16 %v2418_v46, %v1301_v7 }
 0x1d9   : > { %v2236_v12 = vpop.f32.mrb[44].mxu1  ;;  %2302 = vmatprep.mubr.msk.bf16.mxu0 %vm912_vm1, %v1333_v8 }
 0x1da   : > { %v1091_v14 = vpop.f32.mrb[45].mxu1  ;;  %2303 = vmatmul.mubr.msk.bf16.gmra.mrb[40].mxu0 %vm912_vm1, %v1334_v10 }
 0x1db   : > { %v2237_v15 = vpop.f32.mrb[46].mxu1 }
 0x1dc   : > { %v1304_v18 = vpack.c.bf16 %v2237_v15, %v2236_v12  ;;  %v1094_v20 = vpop.f32.mrb[47].mxu1 }
 0x1dd   : > { %v1303_v21 = vpack.c.bf16 %v1094_v20, %v1091_v14 }
 0x1de   : > { %v1336_v24 = vmax.bf16 %v2418_v46, %v1304_v18 }
 0x1df   : > { %v1335_v22 = vmax.bf16 %v2418_v46, %v1303_v21 }
 0x1e1   : > { %v2240_v26 = vpop.f32.mrb[48].mxu1  ;;  %2306 = vmatprep.mubr.msk.bf16.mxu0 %vm912_vm1, %v1335_v22 }
 0x1e2   : > { %v1107_v28 = vpop.f32.mrb[49].mxu1  ;;  %2307 = vmatmul.mubr.msk.bf16.gmra.mrb[44].mxu0 %vm912_vm1, %v1336_v24 }
 0x1e3   : > { %v2241_v29 = vpop.f32.mrb[50].mxu1 }
 0x1e4   : > { %v1306_v32 = vpack.c.bf16 %v2241_v29, %v2240_v26  ;;  %v1110_v34 = vpop.f32.mrb[51].mxu1 }
 0x1e5   : > { %v1305_v35 = vpack.c.bf16 %v1110_v34, %v1107_v28 }
 0x1e6   : > { %v1338_v38 = vmax.bf16 %v2418_v46, %v1306_v32 }
 0x1e7   : > { %v1337_v36 = vmax.bf16 %v2418_v46, %v1305_v35 }
 0x1e9   : > { %v2244_v39 = vpop.f32.mrb[52].mxu1  ;;  %2310 = vmatprep.mubr.msk.bf16.mxu0 %vm912_vm1, %v1337_v36 }
 0x1ea   : > { %v1123_v40 = vpop.f32.mrb[53].mxu1  ;;  %2311 = vmatmul.mubr.msk.bf16.gmra.mrb[48].mxu0 %vm912_vm1, %v1338_v38 }
 0x1eb   : > { %v2245_v61 = vpop.f32.mrb[54].mxu1 }
 0x1ec   : > { %v1308_v3 = vpack.c.bf16 %v2245_v61, %v2244_v39  ;;  %v1126_v5 = vpop.f32.mrb[55].mxu1 }
 0x1ed   : > { %v1307_v42 = vpack.c.bf16 %v1126_v5, %v1123_v40 }
 0x1ee   : > { %v1340_v45 = vmax.bf16 %v2418_v46, %v1308_v3 }
 0x1ef   : > { %v1339_v43 = vmax.bf16 %v2418_v46, %v1307_v42 }
 0x1f1   : > { %v2248_v47 = vpop.f32.mrb[56].mxu1  ;;  %2314 = vmatprep.mubr.msk.bf16.mxu0 %vm912_vm1, %v1339_v43 }
 0x1f2   : > { %v1139_v11 = vpop.f32.mrb[57].mxu1  ;;  %2315 = vmatmul.mubr.msk.bf16.gmra.mrb[52].mxu0 %vm912_vm1, %v1340_v45 }
 0x1f3   : > { %v2249_v59 = vpop.f32.mrb[58].mxu1 }
 0x1f4   : > { %v1310_v63 = vpack.c.bf16 %v2249_v59, %v2248_v47  ;;  %v1142_v2 = vpop.f32.mrb[59].mxu1 }
 0x1f5   : > { %v1309_v17 = vpack.c.bf16 %v1142_v2, %v1139_v11 }
 0x1f6   : > { %v1342_v13 = vmax.bf16 %v2418_v46, %v1310_v63 }
 0x1f7   : > { %v1341_v9 = vmax.bf16 %v2418_v46, %v1309_v17 }
 0x1f9   : > { %v2252_v16 = vpop.f32.mrb[60].mxu1  ;;  %2318 = vmatprep.mubr.msk.bf16.mxu0 %vm912_vm1, %v1341_v9 }
 0x1fa   : > { %v1155_v19 = vpop.f32.mrb[61].mxu1  ;;  %2319 = vmatmul.mubr.msk.bf16.gmra.mrb[56].mxu0 %vm912_vm1, %v1342_v13 }
 0x1fb   : > { %v2253_v23 = vpop.f32.mrb[62].mxu1 }
 0x1fc   : > { %v1312_v25 = vpack.c.bf16 %v2253_v23, %v2252_v16  ;;  %v1158_v27 = vpop.f32.mrb[63].mxu1 }
 0x1fd   : > { %v1311_v30 = vpack.c.bf16 %v1158_v27, %v1155_v19 }
 0x1fe   : > { %v1344_v33 = vmax.bf16 %v2418_v46, %v1312_v25 }
 0x1ff   : > { %v1343_v31 = vmax.bf16 %v2418_v46, %v1311_v30 }
 0x201   : > { %v2256_v37 = vpop.f32.mrb[64].mxu1  ;;  %2322 = vmatprep.mubr.msk.bf16.mxu0 %vm912_vm1, %v1343_v31 }
 0x202   : > { %v1171_v41 = vpop.f32.mrb[65].mxu1  ;;  %2323 = vmatmul.mubr.msk.bf16.gmra.mrb[60].mxu0 %vm912_vm1, %v1344_v33 }
 0x203   : > { %v2257_v44 = vpop.f32.mrb[66].mxu1 }
 0x204   : > { %v1314_v48 = vpack.c.bf16 %v2257_v44, %v2256_v37  ;;  %v1174_v49 = vpop.f32.mrb[67].mxu1 }
 0x205   : > { %v1313_v50 = vpack.c.bf16 %v1174_v49, %v1171_v41 }
 0x206   : > { %v1346_v52 = vmax.bf16 %v2418_v46, %v1314_v48 }
 0x207   : > { %v1345_v51 = vmax.bf16 %v2418_v46, %v1313_v50 }
 0x209   : > { %v2260_v53 = vpop.f32.mrb[68].mxu1  ;;  %2326 = vmatprep.mubr.msk.bf16.mxu0 %vm912_vm1, %v1345_v51 }
 0x20a   : > { %v1187_v54 = vpop.f32.mrb[69].mxu1  ;;  %2327 = vmatmul.mubr.msk.bf16.gmra.mrb[64].mxu0 %vm912_vm1, %v1346_v52 }
 0x20b   : > { %v2261_v55 = vpop.f32.mrb[70].mxu1 }
 0x20c   : > { %v1316_v56 = vpack.c.bf16 %v2261_v55, %v2260_v53  ;;  %v1190_v57 = vpop.f32.mrb[71].mxu1 }
 0x20d   : > { %v1315_v58 = vpack.c.bf16 %v1190_v57, %v1187_v54 }
 0x20e   : > { %v1348_v62 = vmax.bf16 %v2418_v46, %v1316_v56 }
 0x20f   : > { %v1347_v60 = vmax.bf16 %v2418_v46, %v1315_v58 }
 0x211   : > { %v2264_v0 = vpop.f32.mrb[72].mxu1  ;;  %2330 = vmatprep.mubr.msk.bf16.mxu0 %vm912_vm1, %v1347_v60 }
 0x212   : > { %v1203_v1 = vpop.f32.mrb[73].mxu1  ;;  %2331 = vmatmul.mubr.msk.bf16.gmra.mrb[68].mxu0 %vm912_vm1, %v1348_v62 }
 0x213   : > { %v2265_v4 = vpop.f32.mrb[74].mxu1 }
 0x214   : > { %v1318_v6 = vpack.c.bf16 %v2265_v4, %v2264_v0  ;;  %v1206_v7 = vpop.f32.mrb[75].mxu1 }
 0x215   : > { %v1317_v8 = vpack.c.bf16 %v1206_v7, %v1203_v1 }
 0x216   : > { %v1350_v12 = vmax.bf16 %v2418_v46, %v1318_v6 }
 0x217   : > { %v1349_v10 = vmax.bf16 %v2418_v46, %v1317_v8 }
 0x219   : > { %v2268_v14 = vpop.f32.mrb[76].mxu1  ;;  %2334 = vmatprep.mubr.msk.bf16.mxu0 %vm912_vm1, %v1349_v10 }
 0x21a   : > { %v1219_v15 = vpop.f32.mrb[77].mxu1  ;;  %2335 = vmatmul.mubr.msk.bf16.gmra.mrb[72].mxu0 %vm912_vm1, %v1350_v12 }
 0x21b   : > { %v2269_v18 = vpop.f32.mrb[78].mxu1 }
 0x21c   : > { %v1320_v20 = vpack.c.bf16 %v2269_v18, %v2268_v14  ;;  %v1222_v21 = vpop.f32.mrb[79].mxu1 }
 0x21d   : > { %v1319_v22 = vpack.c.bf16 %v1222_v21, %v1219_v15 }
 0x21e   : > { %v1352_v26 = vmax.bf16 %v2418_v46, %v1320_v20 }
 0x21f   : > { %v1351_v24 = vmax.bf16 %v2418_v46, %v1319_v22 }
 0x221   : > { %v2272_v28 = vpop.f32.mrb[80].mxu1  ;;  %2338 = vmatprep.mubr.msk.bf16.mxu0 %vm912_vm1, %v1351_v24 }
 0x222   : > { %v1235_v29 = vpop.f32.mrb[81].mxu1  ;;  %2339 = vmatmul.mubr.msk.bf16.gmra.mrb[76].mxu0 %vm912_vm1, %v1352_v26 }
 0x223   : > { %v2273_v32 = vpop.f32.mrb[82].mxu1 }
 0x224   : > { %v1322_v34 = vpack.c.bf16 %v2273_v32, %v2272_v28  ;;  %v1238_v35 = vpop.f32.mrb[83].mxu1 }
 0x225   : > { %v1321_v36 = vpack.c.bf16 %v1238_v35, %v1235_v29 }
 0x226   : > { %v1354_v39 = vmax.bf16 %v2418_v46, %v1322_v34 }
 0x227   : > { %v1353_v38 = vmax.bf16 %v2418_v46, %v1321_v36 }
 0x229   : > { %v2276_v40 = vpop.f32.mrb[84].mxu1  ;;  %2342 = vmatprep.mubr.msk.bf16.mxu0 %vm912_vm1, %v1353_v38 }
 0x22a   : > { %v1251_v61 = vpop.f32.mrb[85].mxu1  ;;  %2343 = vmatmul.mubr.msk.bf16.gmra.mrb[80].mxu0 %vm912_vm1, %v1354_v39 }
 0x22b   : > { %v2277_v3 = vpop.f32.mrb[86].mxu1 }
 0x22c   : > { %v1324_v5 = vpack.c.bf16 %v2277_v3, %v2276_v40  ;;  %v1254_v42 = vpop.f32.mrb[87].mxu1 }
 0x22d   : > { %v1323_v43 = vpack.c.bf16 %v1254_v42, %v1251_v61 }
 0x22e   : > { %v1356_v47 = vmax.bf16 %v2418_v46, %v1324_v5 }
 0x22f   : > { %v1355_v45 = vmax.bf16 %v2418_v46, %v1323_v43 }
 0x231   : > { %v2280_v11 = vpop.f32.mrb[88].mxu1  ;;  %2346 = vmatprep.mubr.msk.bf16.mxu0 %vm912_vm1, %v1355_v45 }
 0x232   : > { %v1267_v59 = vpop.f32.mrb[89].mxu1  ;;  %2347 = vmatmul.mubr.msk.bf16.gmra.mrb[84].mxu0 %vm912_vm1, %v1356_v47 }
 0x233   : > { %v2281_v63 = vpop.f32.mrb[90].mxu1 }
 0x234   : > { %v1326_v2 = vpack.c.bf16 %v2281_v63, %v2280_v11  ;;  %v1270_v17 = vpop.f32.mrb[91].mxu1 }
 0x235   : > { %v1325_v9 = vpack.c.bf16 %v1270_v17, %v1267_v59 }
 0x236   : > { %v1358_v16 = vmax.bf16 %v2418_v46, %v1326_v2 }
 0x237   : > { %v1357_v13 = vmax.bf16 %v2418_v46, %v1325_v9 }
 0x239   : > { %v2284_v19 = vpop.f32.mrb[92].mxu1  ;;  %2350 = vmatprep.mubr.msk.bf16.mxu0 %vm912_vm1, %v1357_v13 }
 0x23a   : > { %v1283_v23 = vpop.f32.mrb[93].mxu1  ;;  %2351 = vmatmul.mubr.msk.bf16.gmra.mrb[88].mxu0 %vm912_vm1, %v1358_v16  ;;  %v1328_v27 = vpack.c.bf16 %v2284_v19, %v2284_v19 }
 0x23b   : > { %v2285_v25 = vpop.f32.mrb[94].mxu1 }
 0x23c   : > { %v1286_v30 = vpop.f32.mrb[95].mxu1  ;;  %v1360_v37 = vmax.bf16 %v2418_v46, %v1328_v27 }
 0x23d   : > { %v1327_v31 = vpack.c.bf16 %v1286_v30, %v1283_v23 }
 0x23f   : > { %v1359_v33 = vmax.bf16 %v2418_v46, %v1327_v31 }
 0x241   : > { %2354 = vmatprep.mubr.msk.bf16.mxu0 %vm912_vm1, %v1359_v33 }
 0x242   : > { %2355 = vmatmul.mubr.msk.bf16.gmra.mrb[92].mxu0 %vm912_vm1, %v1360_v37 }
 0x29d   : > { %v2296_v46 = vpop.f32.mrb[32].mxu0 }
 0x29e   : > { %1780 = vst.msk [vmem:[%s2752_s18 + $0x10] sm:$0xff] %vm1777_vm2, %v2296_v46  ;;  %v1523_v41 = vpop.f32.mrb[33].mxu0 }
 0x29f   : > { %1778 = vst.msk [vmem:[%s2752_s18] sm:$0xff] %vm1777_vm2, %v1523_v41  ;;  %v2297_v44 = vpop.f32.mrb[34].mxu0 }
 0x2a0   : > { %1781 = vst.msk [vmem:[%s2752_s18 + $0x18] sm:$0xff] %vm1777_vm2, %v2297_v44  ;;  %v1526_v48 = vpop.f32.mrb[35].mxu0 }
 0x2a1   : > { %1779 = vst.msk [vmem:[%s2752_s18 + $0x8] sm:$0xff] %vm1777_vm2, %v1526_v48 }
 0x2a5   : > { %v2300_v49 = vpop.f32.mrb[36].mxu0 }
 0x2a6   : > { %1784 = vst.msk [vmem:[%s2752_s18 + $0x30] sm:$0xff] %vm1777_vm2, %v2300_v49  ;;  %v1539_v50 = vpop.f32.mrb[37].mxu0 }
 0x2a7   : > { %1782 = vst.msk [vmem:[%s2752_s18 + $0x20] sm:$0xff] %vm1777_vm2, %v1539_v50  ;;  %v2301_v51 = vpop.f32.mrb[38].mxu0 }
 0x2a8   : > { %1785 = vst.msk [vmem:[%s2752_s18 + $0x38] sm:$0xff] %vm1777_vm2, %v2301_v51  ;;  %v1542_v52 = vpop.f32.mrb[39].mxu0 }
 0x2a9   : > { %1783 = vst.msk [vmem:[%s2752_s18 + $0x28] sm:$0xff] %vm1777_vm2, %v1542_v52 }
 0x2ad   : > { %v2304_v53 = vpop.f32.mrb[40].mxu0 }
 0x2ae   : > { %1788 = vst.msk [vmem:[%s2752_s18 + $0x50] sm:$0xff] %vm1777_vm2, %v2304_v53  ;;  %v1555_v54 = vpop.f32.mrb[41].mxu0 }
 0x2af   : > { %1786 = vst.msk [vmem:[%s2752_s18 + $0x40] sm:$0xff] %vm1777_vm2, %v1555_v54  ;;  %v2305_v55 = vpop.f32.mrb[42].mxu0 }
 0x2b0   : > { %1789 = vst.msk [vmem:[%s2752_s18 + $0x58] sm:$0xff] %vm1777_vm2, %v2305_v55  ;;  %v1558_v56 = vpop.f32.mrb[43].mxu0 }
 0x2b1   : > { %1787 = vst.msk [vmem:[%s2752_s18 + $0x48] sm:$0xff] %vm1777_vm2, %v1558_v56 }
 0x2b5   : > { %v2308_v57 = vpop.f32.mrb[44].mxu0 }
 0x2b6   : > { %1792 = vst.msk [vmem:[%s2752_s18 + $0x70] sm:$0xff] %vm1777_vm2, %v2308_v57  ;;  %v1571_v58 = vpop.f32.mrb[45].mxu0 }
 0x2b7   : > { %1790 = vst.msk [vmem:[%s2752_s18 + $0x60] sm:$0xff] %vm1777_vm2, %v1571_v58  ;;  %v2309_v60 = vpop.f32.mrb[46].mxu0 }
 0x2b8   : > { %1793 = vst.msk [vmem:[%s2752_s18 + $0x78] sm:$0xff] %vm1777_vm2, %v2309_v60  ;;  %v1574_v62 = vpop.f32.mrb[47].mxu0 }
 0x2b9   : > { %1791 = vst.msk [vmem:[%s2752_s18 + $0x68] sm:$0xff] %vm1777_vm2, %v1574_v62 }
 0x2bd   : > { %v2312_v0 = vpop.f32.mrb[48].mxu0 }
 0x2be   : > { %1796 = vst.msk [vmem:[%s2752_s18 + $0x90] sm:$0xff] %vm1777_vm2, %v2312_v0  ;;  %v1587_v1 = vpop.f32.mrb[49].mxu0 }
 0x2bf   : > { %1794 = vst.msk [vmem:[%s2752_s18 + $0x80] sm:$0xff] %vm1777_vm2, %v1587_v1  ;;  %v2313_v4 = vpop.f32.mrb[50].mxu0 }
 0x2c0   : > { %1797 = vst.msk [vmem:[%s2752_s18 + $0x98] sm:$0xff] %vm1777_vm2, %v2313_v4  ;;  %v1590_v6 = vpop.f32.mrb[51].mxu0 }
 0x2c1   : > { %1795 = vst.msk [vmem:[%s2752_s18 + $0x88] sm:$0xff] %vm1777_vm2, %v1590_v6 }
 0x2c5   : > { %v2316_v7 = vpop.f32.mrb[52].mxu0 }
 0x2c6   : > { %1800 = vst.msk [vmem:[%s2752_s18 + $0xb0] sm:$0xff] %vm1777_vm2, %v2316_v7  ;;  %v1603_v8 = vpop.f32.mrb[53].mxu0 }
 0x2c7   : > { %1798 = vst.msk [vmem:[%s2752_s18 + $0xa0] sm:$0xff] %vm1777_vm2, %v1603_v8  ;;  %v2317_v10 = vpop.f32.mrb[54].mxu0 }
 0x2c8   : > { %1801 = vst.msk [vmem:[%s2752_s18 + $0xb8] sm:$0xff] %vm1777_vm2, %v2317_v10  ;;  %v1606_v12 = vpop.f32.mrb[55].mxu0 }
 0x2c9   : > { %1799 = vst.msk [vmem:[%s2752_s18 + $0xa8] sm:$0xff] %vm1777_vm2, %v1606_v12 }
 0x2cd   : > { %v2320_v14 = vpop.f32.mrb[56].mxu0 }
 0x2ce   : > { %1804 = vst.msk [vmem:[%s2752_s18 + $0xd0] sm:$0xff] %vm1777_vm2, %v2320_v14  ;;  %v1619_v15 = vpop.f32.mrb[57].mxu0 }
 0x2cf   : > { %1802 = vst.msk [vmem:[%s2752_s18 + $0xc0] sm:$0xff] %vm1777_vm2, %v1619_v15  ;;  %v2321_v18 = vpop.f32.mrb[58].mxu0 }
 0x2d0   : > { %1805 = vst.msk [vmem:[%s2752_s18 + $0xd8] sm:$0xff] %vm1777_vm2, %v2321_v18  ;;  %v1622_v20 = vpop.f32.mrb[59].mxu0 }
 0x2d1   : > { %1803 = vst.msk [vmem:[%s2752_s18 + $0xc8] sm:$0xff] %vm1777_vm2, %v1622_v20 }
 0x2d5   : > { %v2324_v21 = vpop.f32.mrb[60].mxu0 }
 0x2d6   : > { %1808 = vst.msk [vmem:[%s2752_s18 + $0xf0] sm:$0xff] %vm1777_vm2, %v2324_v21  ;;  %v1635_v22 = vpop.f32.mrb[61].mxu0 }
 0x2d7   : > { %1806 = vst.msk [vmem:[%s2752_s18 + $0xe0] sm:$0xff] %vm1777_vm2, %v1635_v22  ;;  %v2325_v24 = vpop.f32.mrb[62].mxu0 }
 0x2d8   : > { %1809 = vst.msk [vmem:[%s2752_s18 + $0xf8] sm:$0xff] %vm1777_vm2, %v2325_v24  ;;  %v1638_v26 = vpop.f32.mrb[63].mxu0 }
 0x2d9   : > { %1807 = vst.msk [vmem:[%s2752_s18 + $0xe8] sm:$0xff] %vm1777_vm2, %v1638_v26 }
 0x2dd   : > { %v2328_v28 = vpop.f32.mrb[64].mxu0 }
 0x2de   : > { %1812 = vst.msk [vmem:[%s2752_s18 + $0x110] sm:$0xff] %vm1777_vm2, %v2328_v28  ;;  %v1651_v29 = vpop.f32.mrb[65].mxu0 }
 0x2df   : > { %1810 = vst.msk [vmem:[%s2752_s18 + $0x100] sm:$0xff] %vm1777_vm2, %v1651_v29  ;;  %v2329_v32 = vpop.f32.mrb[66].mxu0 }
 0x2e0   : > { %1813 = vst.msk [vmem:[%s2752_s18 + $0x118] sm:$0xff] %vm1777_vm2, %v2329_v32  ;;  %v1654_v34 = vpop.f32.mrb[67].mxu0 }
 0x2e1   : > { %1811 = vst.msk [vmem:[%s2752_s18 + $0x108] sm:$0xff] %vm1777_vm2, %v1654_v34 }
 0x2e5   : > { %v2332_v35 = vpop.f32.mrb[68].mxu0 }
 0x2e6   : > { %1816 = vst.msk [vmem:[%s2752_s18 + $0x130] sm:$0xff] %vm1777_vm2, %v2332_v35  ;;  %v1667_v36 = vpop.f32.mrb[69].mxu0 }
 0x2e7   : > { %1814 = vst.msk [vmem:[%s2752_s18 + $0x120] sm:$0xff] %vm1777_vm2, %v1667_v36  ;;  %v2333_v38 = vpop.f32.mrb[70].mxu0 }
 0x2e8   : > { %1817 = vst.msk [vmem:[%s2752_s18 + $0x138] sm:$0xff] %vm1777_vm2, %v2333_v38  ;;  %v1670_v39 = vpop.f32.mrb[71].mxu0 }
 0x2e9   : > { %1815 = vst.msk [vmem:[%s2752_s18 + $0x128] sm:$0xff] %vm1777_vm2, %v1670_v39 }
 0x2ed   : > { %v2336_v40 = vpop.f32.mrb[72].mxu0 }
 0x2ee   : > { %1820 = vst.msk [vmem:[%s2752_s18 + $0x150] sm:$0xff] %vm1777_vm2, %v2336_v40  ;;  %v1683_v61 = vpop.f32.mrb[73].mxu0 }
 0x2ef   : > { %1818 = vst.msk [vmem:[%s2752_s18 + $0x140] sm:$0xff] %vm1777_vm2, %v1683_v61  ;;  %v2337_v3 = vpop.f32.mrb[74].mxu0 }
 0x2f0   : > { %1821 = vst.msk [vmem:[%s2752_s18 + $0x158] sm:$0xff] %vm1777_vm2, %v2337_v3  ;;  %v1686_v5 = vpop.f32.mrb[75].mxu0 }
 0x2f1   : > { %1819 = vst.msk [vmem:[%s2752_s18 + $0x148] sm:$0xff] %vm1777_vm2, %v1686_v5 }
 0x2f5   : > { %v2340_v42 = vpop.f32.mrb[76].mxu0 }
 0x2f6   : > { %1824 = vst.msk [vmem:[%s2752_s18 + $0x170] sm:$0xff] %vm1777_vm2, %v2340_v42  ;;  %v1699_v43 = vpop.f32.mrb[77].mxu0 }
 0x2f7   : > { %1822 = vst.msk [vmem:[%s2752_s18 + $0x160] sm:$0xff] %vm1777_vm2, %v1699_v43  ;;  %v2341_v45 = vpop.f32.mrb[78].mxu0 }
 0x2f8   : > { %1825 = vst.msk [vmem:[%s2752_s18 + $0x178] sm:$0xff] %vm1777_vm2, %v2341_v45  ;;  %v1702_v47 = vpop.f32.mrb[79].mxu0 }
 0x2f9   : > { %1823 = vst.msk [vmem:[%s2752_s18 + $0x168] sm:$0xff] %vm1777_vm2, %v1702_v47 }
 0x2fd   : > { %v2344_v11 = vpop.f32.mrb[80].mxu0 }
 0x2fe   : > { %1828 = vst.msk [vmem:[%s2752_s18 + $0x190] sm:$0xff] %vm1777_vm2, %v2344_v11  ;;  %v1715_v59 = vpop.f32.mrb[81].mxu0 }
 0x2ff   : > { %1826 = vst.msk [vmem:[%s2752_s18 + $0x180] sm:$0xff] %vm1777_vm2, %v1715_v59  ;;  %v2345_v63 = vpop.f32.mrb[82].mxu0 }
 0x300   : > { %1829 = vst.msk [vmem:[%s2752_s18 + $0x198] sm:$0xff] %vm1777_vm2, %v2345_v63  ;;  %v1718_v2 = vpop.f32.mrb[83].mxu0 }
 0x301   : > { %1827 = vst.msk [vmem:[%s2752_s18 + $0x188] sm:$0xff] %vm1777_vm2, %v1718_v2 }
 0x305   : > { %v2348_v17 = vpop.f32.mrb[84].mxu0 }
 0x306   : > { %1832 = vst.msk [vmem:[%s2752_s18 + $0x1b0] sm:$0xff] %vm1777_vm2, %v2348_v17  ;;  %v1731_v9 = vpop.f32.mrb[85].mxu0 }
 0x307   : > { %1830 = vst.msk [vmem:[%s2752_s18 + $0x1a0] sm:$0xff] %vm1777_vm2, %v1731_v9  ;;  %v2349_v13 = vpop.f32.mrb[86].mxu0 }
 0x308   : > { %1833 = vst.msk [vmem:[%s2752_s18 + $0x1b8] sm:$0xff] %vm1777_vm2, %v2349_v13  ;;  %v1734_v16 = vpop.f32.mrb[87].mxu0 }
 0x309   : > { %1831 = vst.msk [vmem:[%s2752_s18 + $0x1a8] sm:$0xff] %vm1777_vm2, %v1734_v16 }
 0x30d   : > { %v2352_v19 = vpop.f32.mrb[88].mxu0 }
 0x30e   : > { %1836 = vst.msk [vmem:[%s2752_s18 + $0x1d0] sm:$0xff] %vm1777_vm2, %v2352_v19  ;;  %v1747_v23 = vpop.f32.mrb[89].mxu0 }
 0x30f   : > { %1834 = vst.msk [vmem:[%s2752_s18 + $0x1c0] sm:$0xff] %vm1777_vm2, %v1747_v23  ;;  %v2353_v25 = vpop.f32.mrb[90].mxu0 }
 0x310   : > { %1837 = vst.msk [vmem:[%s2752_s18 + $0x1d8] sm:$0xff] %vm1777_vm2, %v2353_v25  ;;  %v1750_v27 = vpop.f32.mrb[91].mxu0 }
 0x311   : > { %1835 = vst.msk [vmem:[%s2752_s18 + $0x1c8] sm:$0xff] %vm1777_vm2, %v1750_v27 }
 0x315   : > { %v2356_v30 = vpop.f32.mrb[92].mxu0 }
 0x316   : > { %1840 = vst.msk [vmem:[%s2752_s18 + $0x1f0] sm:$0xff] %vm1777_vm2, %v2356_v30  ;;  %v1763_v31 = vpop.f32.mrb[93].mxu0 }
 0x317   : > { %1838 = vst.msk [vmem:[%s2752_s18 + $0x1e0] sm:$0xff] %vm1777_vm2, %v1763_v31  ;;  %v2357_v33 = vpop.f32.mrb[94].mxu0 }
 0x318   : > { %v1766_v37 = vpop.f32.mrb[95].mxu0 }
 0x319   : > { %1839 = vst.msk [vmem:[%s2752_s18 + $0x1e8] sm:$0xff] %vm1777_vm2, %v1766_v37 }
 0x31a PF: > { %s14_s15 = sadd.s32 1, %s2416_s15  }
 0x31b   : > { %p11_p4 = scmp.ge.s32.totalorder %s14_s15, 4  }
 0x31d   :  { %13 = sbr.rel (!%p11_p4) target bundleno = 1 (0x1), region = 66 }

</bundles_post_ra>
